<compile_context>
chip_gen: v7x
topology: tpu7x:2x2x1
jax: 0.10.0
libtpu: 0.0.40
codegen_flags: <defaults>
</compile_context>

<pallas_src>
import functools
import math

import jax
import jax.numpy as jnp
from jax.experimental import pallas as pl
from jax.experimental.pallas import tpu as pltpu


def _msa_kernel(x_ref, wqkv_ref, bqkv_ref, o_ref, *, n_heads, d_head, scale):
    """Single-invocation multi-head self-attention.

    x_ref    : (B, N, d)              input sequences, d = n_heads * d_head
    wqkv_ref : (H, 3*d_head, d_head)  fused Q/K/V weights, PyTorch (out, in)
    bqkv_ref : (H, 1, 3*d_head)       fused Q/K/V biases
    o_ref    : (B, N, d)              output (heads hstacked along d)
    """
    x = x_ref[...].astype(jnp.float32)                # (B, N, d)
    B, N, d = x.shape
    xf = x.reshape(B * N, d)                          # merge leading dims

    head_outs = []
    for h in range(n_heads):                          # tiny H -> static unroll
        seq = xf[:, h * d_head:(h + 1) * d_head]      # (B*N, d_head)
        w = wqkv_ref[h].astype(jnp.float32)           # (3*d_head, d_head)
        b = bqkv_ref[h].astype(jnp.float32)           # (1, 3*d_head)

        # One fused QKV matmul per head: contract seq's feature dim against
        # the PyTorch "in" dim (dim 1) -> (B*N, 3*d_head); no transposes.
        qkv = jax.lax.dot_general(
            seq, w, (((1,), (1,)), ((), ())),
            preferred_element_type=jnp.float32) + b
        qkv = qkv.reshape(B, N, 3 * d_head)

        q = qkv[:, :, :d_head]
        k = qkv[:, :, d_head:2 * d_head]
        v = qkv[:, :, 2 * d_head:]

        # Batched scores: contract d_head, batch over B (no in-kernel k.T).
        scores = jnp.einsum('bqd,bkd->bqk', q, k,
                            preferred_element_type=jnp.float32) * scale

        # Numerically-stable softmax over keys; divide via EUP approx recip.
        m = jnp.max(scores, axis=-1, keepdims=True)
        p = jnp.exp(scores - m)
        attn = p * pl.reciprocal(jnp.sum(p, axis=-1, keepdims=True), approx=True)

        head_outs.append(jnp.einsum('bqk,bkd->bqd', attn, v,
                                    preferred_element_type=jnp.float32))

    # Single store of the full (B, N, d) slab (heads hstacked), lane-denser
    # than per-head (N, d_head) writes.
    o_ref[...] = jnp.concatenate(head_outs, axis=-1).astype(o_ref.dtype)


def my_msa_pallas(x, wq, wk, wv, bq, bk, bv):
    """x: (B, N, d); w*: (n_heads, d_head, d_head) in PyTorch (out, in) layout;
    b*: (n_heads, d_head). Returns (B, N, d), matching MyMSA.forward."""
    B, N, d = x.shape
    n_heads, d_head, _ = wq.shape
    assert d == n_heads * d_head

    # Fuse Q/K/V along the output dim; keep PyTorch (out, in) layout so the
    # kernel's dot_general contracts against dim 1 directly (no transposes).
    w_qkv = jnp.concatenate([wq, wk, wv], axis=1)              # (H, 3*dh, dh)
    b_qkv = jnp.concatenate([bq, bk, bv], axis=1)[:, None, :]  # (H, 1, 3*dh)

    kernel = functools.partial(_msa_kernel, n_heads=n_heads, d_head=d_head,
                               scale=1.0 / math.sqrt(d_head))

    vmem = pl.BlockSpec(memory_space=pltpu.MemorySpace.VMEM)
    return pl.pallas_call(
        kernel,
        out_shape=jax.ShapeDtypeStruct((B, N, d), x.dtype),
        in_specs=[vmem, vmem, vmem],      # whole arrays resident in VMEM
        out_specs=vmem,                   # single (B, N, d) output slab
    )(x, w_qkv, b_qkv)


def my_msa_reference(x, wq, wk, wv, bq, bk, bv):
    """Plain-JAX mirror of the PyTorch forward, for correctness check."""
    B, N, d = x.shape
    n_heads, d_head, _ = wq.shape
    outs = []
    for b in range(B):
        heads = []
        for h in range(n_heads):
            seq = x[b, :, h * d_head:(h + 1) * d_head]
            q = seq @ wq[h].T + bq[h]
            k = seq @ wk[h].T + bk[h]
            v = seq @ wv[h].T + bv[h]
            att = jax.nn.softmax(q @ k.T / math.sqrt(d_head), axis=-1)
            heads.append(att @ v)
        outs.append(jnp.concatenate(heads, axis=-1)[None])
    return jnp.concatenate(outs, axis=0)


if __name__ == "__main__":
    B, N, d, n_heads = 2, 8, 32, 2
    d_head = d // n_heads

    key = jax.random.PRNGKey(0)
    kx, kq, kk, kv, kbq, kbk, kbv = jax.random.split(key, 7)

    x = jax.random.normal(kx, (B, N, d), dtype=jnp.float32)
    # Deterministic synthetic parameters (PyTorch Linear weight layout: (out, in))
    wq = jax.random.normal(kq, (n_heads, d_head, d_head), dtype=jnp.float32) * 0.1
    wk = jax.random.normal(kk, (n_heads, d_head, d_head), dtype=jnp.float32) * 0.1
    wv = jax.random.normal(kv, (n_heads, d_head, d_head), dtype=jnp.float32) * 0.1
    bq = jax.random.normal(kbq, (n_heads, d_head), dtype=jnp.float32) * 0.1
    bk = jax.random.normal(kbk, (n_heads, d_head), dtype=jnp.float32) * 0.1
    bv = jax.random.normal(kbv, (n_heads, d_head), dtype=jnp.float32) * 0.1

    out = my_msa_pallas(x, wq, wk, wv, bq, bk, bv)
    out = jax.block_until_ready(out)

    ref = my_msa_reference(x, wq, wk, wv, bq, bk, bv)
    assert out.shape == (B, N, d)
    # Tolerance accounts for the EUP approximate reciprocal in the softmax
    # denominator (pl.reciprocal(..., approx=True)); exact path matches <1e-5.
    assert jnp.allclose(out, ref, atol=2e-3, rtol=2e-3), "mismatch vs reference"

    print("KERNEL_OK")
</pallas_src>

<mosaic_0001>
module attributes {stable_mosaic.version = 11 : i64} {
  func.func @_msa_kernel(%arg0: memref<2x8x32xf32, #tpu.memory_space<vmem>>, %arg1: memref<2x48x16xf32, #tpu.memory_space<vmem>>, %arg2: memref<2x1x48xf32, #tpu.memory_space<vmem>>, %arg3: memref<2x8x32xf32, #tpu.memory_space<vmem>>) attributes {dimension_semantics = [], scalar_prefetch = 0 : i64, scratch_operands = 0 : i64, tpu.core_type = #tpu.core_type<tc>} {
    %c0 = arith.constant 0 : index
    %c0_0 = arith.constant 0 : index
    %c0_1 = arith.constant 0 : index
    %0 = vector.load %arg0[%c0, %c0_0, %c0_1] : memref<2x8x32xf32, #tpu.memory_space<vmem>>, vector<2x8x32xf32>
    %1 = vector.shape_cast %0 : vector<2x8x32xf32> to vector<16x32xf32>
    %2 = vector.extract_strided_slice %1 {offsets = [0, 0], sizes = [16, 16], strides = [1, 1]} : vector<16x32xf32> to vector<16x16xf32>
    %c0_2 = arith.constant 0 : index
    %c0_3 = arith.constant 0 : index
    %c0_4 = arith.constant 0 : index
    %3 = vector.load %arg1[%c0_2, %c0_3, %c0_4] : memref<2x48x16xf32, #tpu.memory_space<vmem>>, vector<1x48x16xf32>
    %4 = vector.shape_cast %3 : vector<1x48x16xf32> to vector<48x16xf32>
    %c0_5 = arith.constant 0 : index
    %c0_6 = arith.constant 0 : index
    %c0_7 = arith.constant 0 : index
    %5 = vector.load %arg2[%c0_5, %c0_6, %c0_7] : memref<2x1x48xf32, #tpu.memory_space<vmem>>, vector<1x1x48xf32>
    %6 = vector.shape_cast %5 : vector<1x1x48xf32> to vector<1x48xf32>
    %cst = arith.constant dense<0.000000e+00> : vector<16x48xf32>
    %7 = tpu.matmul %2, %4, %cst {dimension_numbers = #tpu.dot_dimension_numbers<[1], [1], [0], [0], [0, 0, 1, 0], [], []>} : vector<16x16xf32>, vector<48x16xf32>, vector<16x48xf32> -> vector<16x48xf32>
    %8 = vector.broadcast %6 : vector<1x48xf32> to vector<16x48xf32>
    %9 = arith.addf %7, %8 : vector<16x48xf32>
    %10 = vector.shape_cast %9 : vector<16x48xf32> to vector<2x8x48xf32>
    %11 = vector.extract_strided_slice %10 {offsets = [0, 0, 0], sizes = [2, 8, 16], strides = [1, 1, 1]} : vector<2x8x48xf32> to vector<2x8x16xf32>
    %12 = vector.extract_strided_slice %10 {offsets = [0, 0, 16], sizes = [2, 8, 16], strides = [1, 1, 1]} : vector<2x8x48xf32> to vector<2x8x16xf32>
    %13 = vector.extract_strided_slice %10 {offsets = [0, 0, 32], sizes = [2, 8, 16], strides = [1, 1, 1]} : vector<2x8x48xf32> to vector<2x8x16xf32>
    "tpu.trace_start"() <{level = 10 : i32, message = "bqd,bkd->bqk"}> : () -> ()
    %cst_8 = arith.constant dense<0.000000e+00> : vector<2x8x8xf32>
    %14 = tpu.matmul %11, %12, %cst_8 {dimension_numbers = #tpu.dot_dimension_numbers<[2], [2], [1], [1], [0, 0, 0, 1, 1, 1], [0], [0]>} : vector<2x8x16xf32>, vector<2x8x16xf32>, vector<2x8x8xf32> -> vector<2x8x8xf32>
    "tpu.trace_stop"() : () -> ()
    %cst_9 = arith.constant 2.500000e-01 : f32
    %15 = vector.broadcast %cst_9 : f32 to vector<2x8x8xf32>
    %16 = arith.mulf %14, %15 : vector<2x8x8xf32>
    %cst_10 = arith.constant dense<0xFF800000> : vector<2x8xf32>
    %17 = vector.multi_reduction <maximumf>, %16, %cst_10 [2] : vector<2x8x8xf32> to vector<2x8xf32>
    %18 = vector.shape_cast %17 : vector<2x8xf32> to vector<2x8x1xf32>
    %19 = vector.broadcast %18 : vector<2x8x1xf32> to vector<2x8x8xf32>
    %20 = arith.subf %16, %19 : vector<2x8x8xf32>
    %21 = math.exp %20 : vector<2x8x8xf32>
    %cst_11 = arith.constant dense<0.000000e+00> : vector<2x8xf32>
    %22 = vector.multi_reduction <add>, %21, %cst_11 [2] : vector<2x8x8xf32> to vector<2x8xf32>
    %23 = vector.shape_cast %22 : vector<2x8xf32> to vector<2x8x1xf32>
    %24 = tpu.reciprocal %23 {approx = true} : vector<2x8x1xf32> -> vector<2x8x1xf32>
    %25 = vector.broadcast %24 : vector<2x8x1xf32> to vector<2x8x8xf32>
    %26 = arith.mulf %21, %25 : vector<2x8x8xf32>
    "tpu.trace_start"() <{level = 10 : i32, message = "bqk,bkd->bqd"}> : () -> ()
    %cst_12 = arith.constant dense<0.000000e+00> : vector<2x8x16xf32>
    %27 = tpu.matmul %26, %13, %cst_12 {dimension_numbers = #tpu.dot_dimension_numbers<[2], [1], [1], [2], [0, 0, 0, 1, 1, 2], [0], [0]>} : vector<2x8x8xf32>, vector<2x8x16xf32>, vector<2x8x16xf32> -> vector<2x8x16xf32>
    "tpu.trace_stop"() : () -> ()
    %28 = vector.extract_strided_slice %1 {offsets = [0, 16], sizes = [16, 16], strides = [1, 1]} : vector<16x32xf32> to vector<16x16xf32>
    %c1 = arith.constant 1 : index
    %c0_13 = arith.constant 0 : index
    %c0_14 = arith.constant 0 : index
    %29 = vector.load %arg1[%c1, %c0_13, %c0_14] : memref<2x48x16xf32, #tpu.memory_space<vmem>>, vector<1x48x16xf32>
    %30 = vector.shape_cast %29 : vector<1x48x16xf32> to vector<48x16xf32>
    %c1_15 = arith.constant 1 : index
    %c0_16 = arith.constant 0 : index
    %c0_17 = arith.constant 0 : index
    %31 = vector.load %arg2[%c1_15, %c0_16, %c0_17] : memref<2x1x48xf32, #tpu.memory_space<vmem>>, vector<1x1x48xf32>
    %32 = vector.shape_cast %31 : vector<1x1x48xf32> to vector<1x48xf32>
    %cst_18 = arith.constant dense<0.000000e+00> : vector<16x48xf32>
    %33 = tpu.matmul %28, %30, %cst_18 {dimension_numbers = #tpu.dot_dimension_numbers<[1], [1], [0], [0], [0, 0, 1, 0], [], []>} : vector<16x16xf32>, vector<48x16xf32>, vector<16x48xf32> -> vector<16x48xf32>
    %34 = vector.broadcast %32 : vector<1x48xf32> to vector<16x48xf32>
    %35 = arith.addf %33, %34 : vector<16x48xf32>
    %36 = vector.shape_cast %35 : vector<16x48xf32> to vector<2x8x48xf32>
    %37 = vector.extract_strided_slice %36 {offsets = [0, 0, 0], sizes = [2, 8, 16], strides = [1, 1, 1]} : vector<2x8x48xf32> to vector<2x8x16xf32>
    %38 = vector.extract_strided_slice %36 {offsets = [0, 0, 16], sizes = [2, 8, 16], strides = [1, 1, 1]} : vector<2x8x48xf32> to vector<2x8x16xf32>
    %39 = vector.extract_strided_slice %36 {offsets = [0, 0, 32], sizes = [2, 8, 16], strides = [1, 1, 1]} : vector<2x8x48xf32> to vector<2x8x16xf32>
    "tpu.trace_start"() <{level = 10 : i32, message = "bqd,bkd->bqk"}> : () -> ()
    %cst_19 = arith.constant dense<0.000000e+00> : vector<2x8x8xf32>
    %40 = tpu.matmul %37, %38, %cst_19 {dimension_numbers = #tpu.dot_dimension_numbers<[2], [2], [1], [1], [0, 0, 0, 1, 1, 1], [0], [0]>} : vector<2x8x16xf32>, vector<2x8x16xf32>, vector<2x8x8xf32> -> vector<2x8x8xf32>
    "tpu.trace_stop"() : () -> ()
    %cst_20 = arith.constant 2.500000e-01 : f32
    %41 = vector.broadcast %cst_20 : f32 to vector<2x8x8xf32>
    %42 = arith.mulf %40, %41 : vector<2x8x8xf32>
    %cst_21 = arith.constant dense<0xFF800000> : vector<2x8xf32>
    %43 = vector.multi_reduction <maximumf>, %42, %cst_21 [2] : vector<2x8x8xf32> to vector<2x8xf32>
    %44 = vector.shape_cast %43 : vector<2x8xf32> to vector<2x8x1xf32>
    %45 = vector.broadcast %44 : vector<2x8x1xf32> to vector<2x8x8xf32>
    %46 = arith.subf %42, %45 : vector<2x8x8xf32>
    %47 = math.exp %46 : vector<2x8x8xf32>
    %cst_22 = arith.constant dense<0.000000e+00> : vector<2x8xf32>
    %48 = vector.multi_reduction <add>, %47, %cst_22 [2] : vector<2x8x8xf32> to vector<2x8xf32>
    %49 = vector.shape_cast %48 : vector<2x8xf32> to vector<2x8x1xf32>
    %50 = tpu.reciprocal %49 {approx = true} : vector<2x8x1xf32> -> vector<2x8x1xf32>
    %51 = vector.broadcast %50 : vector<2x8x1xf32> to vector<2x8x8xf32>
    %52 = arith.mulf %47, %51 : vector<2x8x8xf32>
    "tpu.trace_start"() <{level = 10 : i32, message = "bqk,bkd->bqd"}> : () -> ()
    %cst_23 = arith.constant dense<0.000000e+00> : vector<2x8x16xf32>
    %53 = tpu.matmul %52, %39, %cst_23 {dimension_numbers = #tpu.dot_dimension_numbers<[2], [1], [1], [2], [0, 0, 0, 1, 1, 2], [0], [0]>} : vector<2x8x8xf32>, vector<2x8x16xf32>, vector<2x8x16xf32> -> vector<2x8x16xf32>
    "tpu.trace_stop"() : () -> ()
    %54 = tpu.concatenate %27, %53 in 2 : vector<2x8x16xf32>, vector<2x8x16xf32> -> vector<2x8x32xf32>
    %c0_24 = arith.constant 0 : index
    %c0_25 = arith.constant 0 : index
    %c0_26 = arith.constant 0 : index
    %55 = vector.load %arg3[%c0_24, %c0_25, %c0_26] : memref<2x8x32xf32, #tpu.memory_space<vmem>>, vector<2x8x32xf32>
    tpu.vector_store %arg3[%c0_24, %c0_25, %c0_26], %54 {strides = array<i32>} : memref<2x8x32xf32, #tpu.memory_space<vmem>>, vector<2x8x32xf32>,
    return
  }
}

</mosaic_0001>

<bundles_post_ra>
// kernel: tpu_custom_call.1
= control target key start
LH: loop header
LB: loop body
LE: loop exit
PB: predicated region body
PF: predicated region fallthrough
CT: control target
= control target key end

     0   :  { %vm30_vm0 = vcmask 130048   ;;  %s1347_s0 = inlined_call_operand.vmem [shape: f32[2,8,32], index: 0, kind: input, shape index: {}]   ;;  %s1348_s1 = inlined_call_operand.vmem [shape: f32[2,48,16], index: 1, kind: input, shape index: {}]   ;;  %s1349_s2 = inlined_call_operand.vmem [shape: f32[2,1,48], index: 2, kind: input, shape index: {}]   ;;  %s1350_s3 = inlined_call_operand.hbm [shape: f32[2,8,32], index: 3, kind: output, shape index: {}]  }
   0x1   :  { %v17_v0 = vld [vmem:[%s1348_s1] sm:$0xff]  ;;  %v18_v1 = vld [vmem:[%s1348_s1 + $0x8] sm:$0xff]  ;;  %v19_v2 = vld [vmem:[%s1348_s1 + $0x10] sm:$0xff] }
   0x2   :  { %v1075_v3 = vpack.c.bf16 %v18_v1, %v17_v0  ;;  %vm1198_vm1 = vmpackc.low %vm30_vm0, %vm30_vm0  ;;  %v20_v5 = vld [vmem:[%s1348_s1 + $0x18] sm:$0xff]  ;;  %v1208_v7 = vld [vmem:[%s1347_s0] sm:$0xff] }
   0x3   :  { %v1081_v6 = vpack.c.bf16 %v20_v5, %v19_v2  ;;  %1017 = vmatprep.mubr.msk.f32.mxu0 %vm30_vm0, %v1208_v7 }
   0x4   :  { %1077 = vmatprep.subr.msk.bf16.mxu0 %vm1198_vm1, %v1075_v3 }
   0x5   :  { %8 = vsyncpa [#allocation3], 0  ;;  %1080 = vmatpush3.bf16.xpose.msk.msra.mxu0 %vm1198_vm1, %v1075_v3  ;;  %v21_v8 = vld [vmem:[%s1348_s1 + $0x20] sm:$0xff]  ;;  %v22_v9 = vld [vmem:[%s1348_s1 + $0x28] sm:$0xff]  ;;  %v1159_v12 = vmov 0.0   ;;  %vm1160_vm2 = vmmov 0  }
   0x6   :  { %1083 = vmatprep.subr.msk.bf16.mxu0 %vm1198_vm1, %v1081_v6  ;;  %v1087_v10 = vpack.c.bf16 %v22_v9, %v21_v8  ;;  %v16_v11 = vld [vmem:[%s1347_s0 + $0x8] sm:$0xff]  ;;  %1020 = vmatprep.subr.mxu1 %v1159_v12  ;;  %v936_v13 = vld [vmem:[%s1349_s2] ss:$0 sm:$0xff]  ;;  %s1161_s0 = smov 112   ;;  %vm286_vm3 = vcmask 64512   ;;  %s1162_s30 = smov 96  }
   0x7   :  { %1022 = vmatprep.mubr.msk.f32.mxu1 %vm1160_vm2, %v1159_v12  ;;  %v951_v41 = vld [vmem:[%s1348_s1 + $0x30] sm:$0xff]  ;;  %v952_v42 = vld [vmem:[%s1348_s1 + $0x38] sm:$0xff]  ;;  %v953_v49 = vld [vmem:[%s1348_s1 + $0x40] sm:$0xff]  ;;  %vm917_vm4 = vcmask 261120   ;;  %s1164_s17 = smov [#allocation2]  }
   0x8   :  { %v1093_v46 = vpack.c.bf16 %v952_v42, %v951_v41  ;;  %v954_v50 = vld [vmem:[%s1348_s1 + $0x48] sm:$0xff]  ;;  %v955_v53 = vld [vmem:[%s1348_s1 + $0x50] sm:$0xff]  ;;  %v956_v54 = vld [vmem:[%s1348_s1 + $0x58] sm:$0xff]  ;;  %s925_s18 = sshll.u32 %s1164_s17, 4  ;;  %s926_s18 = int_to_ptr.vmem [resolvable:$true] %s925_s18 }
   0x9   :  { %v1099_v52 = vpack.c.bf16 %v954_v50, %v953_v49  ;;  %v1105_v55 = vpack.c.bf16 %v956_v54, %v955_v53  ;;  %v958_v61 = vld [vmem:[%s1349_s2 + $0x1] ss:$0 sm:$0xff]  ;;  %s1163_s2 = smov 16   ;;  %s1135_s19 = scalar_lea.vmem %s926_s18, 256 }
   0xa   :  { %p1136_p0 = scmp.ne.s32.totalorder %s926_s18, %s1135_s19  ;;  %p1140_p1 = scmp.lt.s32.totalorder %s926_s18, %s926_s18 }
   0xb   :  { %p1141_p2 = scmp.lt.s32.totalorder %s1135_s19, %s1135_s19 }
   0xd   :  { %1086 = vmatpush3.bf16.xpose.msk.msra.mxu0 %vm1198_vm1, %v1081_v6  ;;  %p1142_p3 = por %p1141_p2, %p1140_p1 }
   0xe   :  { %1089 = vmatprep.subr.msk.bf16.mxu0 %vm1198_vm1, %v1087_v10 }
   0xf   :  { %p1143_p4 = pnand %p1142_p3, %p1136_p0 }
  0x15   :  { %1092 = vmatpush3.bf16.xpose.msk.msra.mxu0 %vm1198_vm1, %v1087_v10 }
  0x16   :  { %1055 = vmatprep.subr.mxu0 %v1159_v12 }
  0x1c   :  { %1018 = vmatmul.mubr.msk.f32.vlgmr.msra.gmra.mrb[0].mxu0 %vm30_vm0, %v16_v11 }
  0x1d   :  { %1057 = vmatprep.mubr.msk.f32.mxu0 %vm1160_vm2, %v1159_v12 }
  0xef   :  { %v1019_v14 = vpop.f32.mrb[0].mxu0 }
  0xf0   :  { %v121_v15 = vpop.f32.mrb[1].mxu0  ;;  %v127_v17 = vadd.f32 %v1019_v14, %v936_v13 }
  0xf1   :  { %v122_v16 = vadd.f32 %v936_v13, %v121_v15 }
  0xf3   :  { %131 = vrot.lane.b32.xlu0 %v122_v16, %s1161_s0 }
  0xf7   :  { %208 = vrot.lane.b32.xlu0 %v127_v17, %s1161_s0 }
 0x165   :  { %v132_v18 = vpop.permute.xlu0 %131 }
 0x166   :  { %1021 = vmatpush3.xpose.msk.msra.mxu1 %vm30_vm0, %v132_v18 }
 0x167   :  { %1025 = vmatprep.subr.mxu1 %v1159_v12 }
 0x169   :  { %1023 = vmatmul.mubr.msk.f32.vlgmr.msra.gmra.mrb[0].mxu1 %vm30_vm0, %v122_v16  ;;  %v209_v19 = vpop.permute.xlu0 %208 }
 0x16a   :  { %1026 = vmatpush3.xpose.msk.msra.mxu1 %vm30_vm0, %v209_v19  ;;  %1027 = vmatprep.mubr.msk.f32.mxu1 %vm1160_vm2, %v1159_v12 }
 0x16b   :  { %1030 = vmatprep.subr.mxu1 %v1159_v12 }
 0x16d   :  { %1028 = vmatmul.mubr.msk.f32.vlgmr.msra.gmra.mrb[2].mxu1 %vm30_vm0, %v127_v17 }
 0x16e   :  { %1032 = vmatprep.mubr.msk.f32.mxu1 %vm1160_vm2, %v1159_v12 }
 0x23c   :  { %v203_v20 = vpop.f32.mrb[0].mxu1 }
 0x23d   :  { %v284_v21 = vmul.f32 0.25, %v203_v20  ;;  %v1024_v22 = vpop.f32.mrb[1].mxu1 }
 0x23f   :  { %v287_v23 = vsel %vm286_vm3, %v284_v21, -inf }
 0x240   :  { %288 = vmax.xlane.f32.xlu1 %v287_v23  ;;  %v280_v24 = vpop.f32.mrb[2].mxu1 }
 0x241   :  { %v285_v25 = vmul.f32 0.25, %v280_v24  ;;  %v1029_v26 = vpop.f32.mrb[3].mxu1 }
 0x243   :  { %v290_v27 = vsel %vm286_vm3, %v285_v25, -inf }
 0x244   :  { %291 = vmax.xlane.f32.xlu1 %v290_v27 }
 0x255   :  { %309 = vrot.lane.b32.xlu1 %v122_v16, %s1162_s30 }
 0x2cd   :  { %v289_v28 = vpop.xlane.xlu1 %288 }
 0x2ce   :  { %v293_v29 = vsub.f32 %v284_v21, %v289_v28 }
 0x2d0   :  { %v295_v30 = vmul.f32 1.442695, %v293_v29 }
 0x2d1   :  { %v292_v31 = vpop.xlane.xlu1 %291 }
 0x2d2   :  { %1119 = vpow2.f32 %v295_v30  ;;  %v294_v32 = vsub.f32 %v285_v25, %v292_v31 }
 0x2d4   :  { %v297_v33 = vmul.f32 1.442695, %v294_v32 }
 0x2d5   :  { %v310_v34 = vpop.permute.xlu1 %309 }
 0x2d6   :  { %1121 = vpow2.f32 %v297_v33  ;;  %1031 = vmatpush3.msra.mxu1 %v310_v34 }
 0x2d7   :  { %1035 = vmatprep.subr.mxu1 %v1159_v12 }
 0x2dc   :  { %v1120_v35 = vpop.eup %1119 }
 0x2dd   :  { %v299_v36 = vsel %vm286_vm3, %v1120_v35, 0.0 }
 0x2de   :  { %300 = vadd.xlane.f32.xlu0 %v299_v36 }
 0x2e0   :  { %v1122_v37 = vpop.eup %1121 }
 0x2e1   :  { %v302_v38 = vsel %vm286_vm3, %v1122_v37, 0.0 }
 0x2e2   :  { %303 = vadd.xlane.f32.xlu1 %v302_v38 }
 0x2f3   :  { %385 = vrot.lane.b32.xlu1 %v127_v17, %s1162_s30 }
 0x2f7   :  { %476 = vrot.lane.b32.xlu1 %v1208_v7, %s1161_s0 }
 0x2fb   :  { %478 = vrot.lane.b32.xlu1 %v16_v11, %s1161_s0 }
 0x36b   :  { %v301_v39 = vpop.xlane.xlu0 %300 }
 0x36c   :  { %1123 = vrcp.f32 %v301_v39 }
 0x36f   :  { %v304_v40 = vpop.xlane.xlu1 %303 }
 0x370   :  { %1125 = vrcp.f32 %v304_v40 }
 0x373   :  { %v386_v45 = vpop.permute.xlu1 %385 }
 0x376   :  { %v1124_v43 = vpop.eup %1123 }
 0x377   :  { %v307_v44 = vmul.f32 %v1124_v43, %v1120_v35  ;;  %v477_v51 = vpop.permute.xlu1 %476 }
 0x379   :  { %1033 = vmatmul.mubr.msk.f32.vlgmr.msra.gmra.mrb[4].mxu1 %vm286_vm3, %v307_v44 }
 0x37a   :  { %v1126_v47 = vpop.eup %1125  ;;  %1036 = vmatpush3.msra.mxu1 %v386_v45  ;;  %1037 = vmatprep.mubr.msk.f32.mxu1 %vm1160_vm2, %v1159_v12 }
 0x37b   :  { %v308_v48 = vmul.f32 %v1126_v47, %v1122_v37  ;;  %1095 = vmatprep.subr.msk.bf16.mxu1 %vm1198_vm1, %v1093_v46  ;;  %v479_v56 = vpop.permute.xlu1 %478 }
 0x37d   :  { %1038 = vmatmul.mubr.msk.f32.vlgmr.msra.gmra.mrb[6].mxu1 %vm286_vm3, %v308_v48 }
 0x37e   :  { %1052 = vmatprep.mubr.msk.f32.mxu1 %vm30_vm0, %v477_v51 }
 0x381   :  { %1098 = vmatpush3.bf16.xpose.msk.msra.mxu1 %vm1198_vm1, %v1093_v46 }
 0x382   :  { %1101 = vmatprep.subr.msk.bf16.mxu1 %vm1198_vm1, %v1099_v52 }
 0x389   :  { %1104 = vmatpush3.bf16.xpose.msk.msra.mxu1 %vm1198_vm1, %v1099_v52 }
 0x38a   :  { %1107 = vmatprep.subr.msk.bf16.mxu1 %vm1198_vm1, %v1105_v55 }
 0x391   :  { %1110 = vmatpush3.bf16.xpose.msk.msra.mxu1 %vm1198_vm1, %v1105_v55 }
 0x398   :  { %1053 = vmatmul.mubr.msk.f32.vlgmr.msra.gmra.mrb[8].mxu1 %vm30_vm0, %v479_v56 }
 0x44c   :  { %v1301_v57 = vpop.f32.mrb[4].mxu1 }
 0x44d   :  { %v1034_v58 = vpop.f32.mrb[5].mxu1 }
 0x450   :  { %v1303_v59 = vpop.f32.mrb[6].mxu1 }
 0x451   :  { %v1039_v60 = vpop.f32.mrb[7].mxu1 }
 0x46b   :  { %v1054_v62 = vpop.f32.mrb[8].mxu1 }
 0x46c   :  { %v574_v63 = vadd.f32 %v1054_v62, %v958_v61  ;;  %v568_v0 = vpop.f32.mrb[9].mxu1 }
 0x46d   :  { %v569_v1 = vadd.f32 %v958_v61, %v568_v0 }
 0x46e   :  { %655 = vrot.lane.b32.xlu1 %v574_v63, %s1161_s0 }
 0x46f   :  { %578 = vrot.lane.b32.xlu0 %v569_v1, %s1161_s0 }
 0x4e0   :  { %v656_v3 = vpop.permute.xlu1 %655 }
 0x4e1   :  { %v579_v2 = vpop.permute.xlu0 %578 }
 0x4e2   :  { %1056 = vmatpush3.xpose.msk.msra.mxu0 %vm30_vm0, %v579_v2 }
 0x4e3   :  { %1060 = vmatprep.subr.mxu0 %v1159_v12 }
 0x4e5   :  { %1058 = vmatmul.mubr.msk.f32.vlgmr.msra.gmra.mrb[2].mxu0 %vm30_vm0, %v569_v1 }
 0x4e6   :  { %1061 = vmatpush3.xpose.msk.msra.mxu0 %vm30_vm0, %v656_v3  ;;  %1062 = vmatprep.mubr.msk.f32.mxu0 %vm1160_vm2, %v1159_v12 }
 0x4e7   :  { %1065 = vmatprep.subr.mxu0 %v1159_v12 }
 0x4e9   :  { %1063 = vmatmul.mubr.msk.f32.vlgmr.msra.gmra.mrb[4].mxu0 %vm30_vm0, %v574_v63 }
 0x4ea   :  { %1067 = vmatprep.mubr.msk.f32.mxu0 %vm1160_vm2, %v1159_v12 }
 0x5b8   :  { %v650_v4 = vpop.f32.mrb[2].mxu0 }
 0x5b9   :  { %v731_v5 = vmul.f32 0.25, %v650_v4  ;;  %v1059_v6 = vpop.f32.mrb[3].mxu0 }
 0x5bb   :  { %v733_v7 = vsel %vm286_vm3, %v731_v5, -inf }
 0x5bc   :  { %734 = vmax.xlane.f32.xlu1 %v733_v7  ;;  %v727_v8 = vpop.f32.mrb[4].mxu0 }
 0x5bd   :  { %v732_v9 = vmul.f32 0.25, %v727_v8  ;;  %v1064_v10 = vpop.f32.mrb[5].mxu0 }
 0x5bf   :  { %v736_v11 = vsel %vm286_vm3, %v732_v9, -inf }
 0x5c0   :  { %737 = vmax.xlane.f32.xlu0 %v736_v11 }
 0x5d6   :  { %831 = vrot.lane.b32.xlu0 %v574_v63, %s1162_s30 }
 0x649   :  { %v735_v13 = vpop.xlane.xlu1 %734 }
 0x64a   :  { %v739_v14 = vsub.f32 %v731_v5, %v735_v13 }
 0x64c   :  { %v741_v15 = vmul.f32 1.442695, %v739_v14 }
 0x64d   :  { %v738_v16 = vpop.xlane.xlu0 %737 }
 0x64e   :  { %1127 = vpow2.f32 %v741_v15  ;;  %v740_v17 = vsub.f32 %v732_v9, %v738_v16 }
 0x650   :  { %v743_v18 = vmul.f32 1.442695, %v740_v17 }
 0x651   :  { %v832_v28 = vpop.permute.xlu0 %831 }
 0x652   :  { %1129 = vpow2.f32 %v743_v18 }
 0x658   :  { %v1128_v19 = vpop.eup %1127 }
 0x659   :  { %v745_v20 = vsel %vm286_vm3, %v1128_v19, 0.0 }
 0x65a   :  { %746 = vadd.xlane.f32.xlu1 %v745_v20 }
 0x65c   :  { %v1130_v21 = vpop.eup %1129 }
 0x65d   :  { %v748_v22 = vsel %vm286_vm3, %v1130_v21, 0.0 }
 0x65e   :  { %749 = vadd.xlane.f32.xlu1 %v748_v22 }
 0x66f   :  { %755 = vrot.lane.b32.xlu1 %v569_v1, %s1162_s30 }
 0x6e7   :  { %v747_v23 = vpop.xlane.xlu1 %746 }
 0x6e8   :  { %1131 = vrcp.f32 %v747_v23 }
 0x6eb   :  { %v750_v24 = vpop.xlane.xlu1 %749 }
 0x6ec   :  { %1133 = vrcp.f32 %v750_v24 }
 0x6ef   :  { %v756_v25 = vpop.permute.xlu1 %755 }
 0x6f0   :  { %1066 = vmatpush3.msra.mxu0 %v756_v25 }
 0x6f1   :  { %1070 = vmatprep.subr.mxu0 %v1159_v12 }
 0x6f2   :  { %v1132_v26 = vpop.eup %1131 }
 0x6f3   :  { %v753_v27 = vmul.f32 %v1132_v26, %v1128_v19 }
 0x6f5   :  { %1068 = vmatmul.mubr.msk.f32.vlgmr.msra.gmra.mrb[6].mxu0 %vm286_vm3, %v753_v27 }
 0x6f6   :  { %v1134_v29 = vpop.eup %1133  ;;  %1071 = vmatpush3.msra.mxu0 %v832_v28  ;;  %1072 = vmatprep.mubr.msk.f32.mxu0 %vm1160_vm2, %v1159_v12 }
 0x6f7   :  { %v754_v30 = vmul.f32 %v1134_v29, %v1130_v21 }
 0x6f9   :  { %1073 = vmatmul.mubr.msk.f32.vlgmr.msra.gmra.mrb[8].mxu0 %vm286_vm3, %v754_v30 }
 0x7c8   :  { %v827_v31 = vpop.f32.mrb[6].mxu0 }
 0x7c9   :  { %909 = vrot.lane.b32.xlu1 %v827_v31, %s1163_s2  ;;  %v1069_v32 = vpop.f32.mrb[7].mxu0 }
 0x7cc   :  { %v903_v33 = vpop.f32.mrb[8].mxu0 }
 0x7cd   :  { %911 = vrot.lane.b32.xlu1 %v903_v33, %s1163_s2  ;;  %v1074_v34 = vpop.f32.mrb[9].mxu0 }
 0x83b   :  { %v910_v35 = vpop.permute.xlu1 %909 }
 0x83c   :  { %v915_v36 = vsel %vm30_vm0, %v1301_v57, %v910_v35 }
 0x83d   :  { %918 = vst.msk [vmem:[#allocation2] sm:$0xff] %vm917_vm4, %v915_v36 }
 0x83f   :  { %v912_v37 = vpop.permute.xlu1 %911 }
 0x840   :  { %v916_v12 = vsel %vm30_vm0, %v1303_v59, %v912_v37 }
 0x841   :  { %919 = vst.msk [vmem:[#allocation2 + $0x8] sm:$0xff] %vm917_vm4, %v916_v12 }
 0x842   :  { %1146 = shalt.err (!%p1143_p4)
}
 0x843   :  { %s1147_s22 = scalar_lea.hbm %s1350_s3, 256 }
 0x844   :  { %p1148_p5 = scmp.ne.s32.totalorder %s1350_s3, %s1147_s22  ;;  %p1151_p6 = scmp.lt.u32.totalorder %s1147_s22, %s1350_s3 }
 0x846   :  { %p1153_p7 = pnand %p1151_p6, %p1148_p5 }
 0x848   :  { %1156 = shalt.err (!%p1153_p7)
}
 0x849   :  { %s1165_s27 = smov 128   ;;  %s1166_s28 = smov 8  }
 0x84a   :  { %931 = dma.vmem_to_hbm [thread:$0]  %s926_s18, 256, %s1350_s3, [#allocation3], %s1165_s27, %s1165_s27, %s1166_s28  }
 0x84b   :  { %1157 = dma.done.wait [#allocation3], 256  }
 0x84c   :  { %1158 = vsyncadd [#allocation3], 4294967040 }
 0x84d   :  { %935 = vsyncpa [#allocation3], 1 }

</bundles_post_ra>
